<compile_context>
chip_gen: v5e
topology: v5e:2x2
jax: 0.10.0
libtpu: 0.0.40
codegen_flags: <defaults>
</compile_context>

<pallas_src>
import jax
import jax.numpy as jnp
import numpy as np
from jax import lax
from jax.experimental import pallas as pl
from jax.experimental.pallas import tpu as pltpu


def wn_conv1d_kernel(x_ref, v_ref, g_ref, b_ref, o_ref):
    """Fused weight-norm + Conv1d(kernel=KW, stride=1, padding='same') + bias.

    x_ref: (Cin, L + KW - 1)  zero-padded NCL slab for one batch element
    v_ref: (Cout, Cin*KW)     weight_norm direction v, (Cin, KW) flattened
    g_ref: (Cout, 1)          weight_norm magnitude g
    b_ref: (Cout, 1)          conv bias
    o_ref: (Cout, L)          lane-dense output slab
    """
    cout, l_out = o_ref.shape
    cin = x_ref.shape[0]
    kw = v_ref.shape[1] // cin

    # weight_norm (dim=0): w = v * g / ||v||  per output channel.
    v = v_ref[...]
    sumsq = jnp.sum(v * v, axis=-1, keepdims=True)        # (Cout, 1)  XLU reduce
    w = v * (g_ref[...] * lax.rsqrt(sumsq))                # EUP rsqrt + VPU mul

    x = x_ref[...]                                         # (Cin, L+KW-1)

    # Fold the bias into the accumulator init.
    acc = jnp.broadcast_to(b_ref[...], (cout, l_out)).astype(jnp.float32)

    # Contraction depth Cin*KW is tiny -> VPU broadcast-FMAs on the (Cout, L)
    # tile instead of a degenerate-K MXU matmul.  Each tap is a shifted
    # lane-window slice of the padded slab (in-kernel "im2col").
    for k in range(kw):
        xk = x[:, k:k + l_out]                             # (Cin, L) lane window
        for ci in range(cin):
            idx = ci * kw + k
            w_col = w[:, idx:idx + 1]                      # (Cout, 1)
            acc = acc + w_col * xk[ci:ci + 1, :]           # (Cout,1)*(1,L) FMA
    o_ref[...] = acc.astype(o_ref.dtype)


def weight_norm_conv1d(x, v, g, b):
    """Forward of WeightNormalizationConv1D: y = conv1d(x, g*v/||v||, b).

    x: (B, Cin, L) NCL, v: (Cout, Cin, KW), g: (Cout,), b: (Cout,).
    The wrapped conv uses stride=1, padding=(KW-1)//2 ('same').
    """
    B, Cin, L = x.shape
    Cout, Cin_w, KW = v.shape
    assert Cin_w == Cin
    # TODO(synk): only odd-kernel, stride-1 'same' Conv1d wired up; for large
    # Cin*KW switch the FMA loop to an MXU im2col matmul, and for large L add
    # a row-tiled grid axis over L (with halo) so tiles stay within VMEM.
    assert KW % 2 == 1
    pad = (KW - 1) // 2
    Lp = L + 2 * pad

    # Only non-fused op: zero halo for the SAME convolution (tiny).
    xpad = jnp.pad(x, ((0, 0), (0, 0), (pad, pad)))
    v2d = v.reshape(Cout, Cin * KW)
    g2d = g.reshape(Cout, 1)
    b2d = b.reshape(Cout, 1)

    return pl.pallas_call(
        wn_conv1d_kernel,
        grid=(B,),
        in_specs=[
            # None squeezes the batch dim out of the kernel Ref.
            pl.BlockSpec((None, Cin, Lp), lambda i: (i, 0, 0)),
            pl.BlockSpec((Cout, Cin * KW), lambda i: (0, 0)),
            pl.BlockSpec((Cout, 1), lambda i: (0, 0)),
            pl.BlockSpec((Cout, 1), lambda i: (0, 0)),
        ],
        out_specs=pl.BlockSpec((None, Cout, L), lambda i: (i, 0, 0)),
        out_shape=jax.ShapeDtypeStruct((B, Cout, L), jnp.float32),
        compiler_params=pltpu.CompilerParams(
            dimension_semantics=("parallel",)),
    )(xpad, v2d, g2d, b2d)


def reference_forward(x, v, g, b):
    """Pure-JAX reference (weight_norm + conv1d, f32 HIGHEST precision)."""
    norm = jnp.sqrt(jnp.sum(v * v, axis=(1, 2), keepdims=True))
    w = v * (g.reshape(-1, 1, 1) / norm)
    pad = (v.shape[2] - 1) // 2
    y = lax.conv_general_dilated(
        x, w, window_strides=(1,), padding=[(pad, pad)],
        dimension_numbers=("NCH", "OIH", "NCH"),
        precision=lax.Precision.HIGHEST)
    return y + b[None, :, None]


if __name__ == "__main__":
    B, Cin, Cout, L, KW = 2, 4, 16, 128, 3

    key = jax.random.PRNGKey(0)
    kx, kv, kg, kb = jax.random.split(key, 4)
    x = jax.random.normal(kx, (B, Cin, L), jnp.float32)
    v = 0.2 * jax.random.normal(kv, (Cout, Cin, KW), jnp.float32)
    # PyTorch weight_norm init sets g = ||v|| (so w == v initially); perturb it
    # so the g-path is actually exercised.
    g = jnp.sqrt(jnp.sum(v * v, axis=(1, 2))) * (
        1.0 + 0.1 * jax.random.normal(kg, (Cout,), jnp.float32))
    b = 0.1 * jax.random.normal(kb, (Cout,), jnp.float32)

    y = jax.block_until_ready(jax.jit(weight_norm_conv1d)(x, v, g, b))

    y_ref = reference_forward(x, v, g, b)
    np.testing.assert_allclose(np.asarray(y), np.asarray(y_ref),
                               rtol=1e-4, atol=1e-5)
    assert y.shape == (B, Cout, L)
    print("KERNEL_OK")
</pallas_src>

<mosaic_0001>
module attributes {stable_mosaic.version = 11 : i64} {
  func.func @wn_conv1d_kernel(%arg0: i32, %arg1: memref<1x4x130xf32, #tpu.memory_space<vmem>>, %arg2: memref<16x12xf32, #tpu.memory_space<vmem>>, %arg3: memref<16x1xf32, #tpu.memory_space<vmem>>, %arg4: memref<16x1xf32, #tpu.memory_space<vmem>>, %arg5: memref<1x16x128xf32, #tpu.memory_space<vmem>>) attributes {dimension_semantics = [#tpu.dimension_semantics<parallel>], iteration_bounds = array<i64: 2>, scalar_prefetch = 0 : i64, scratch_operands = 0 : i64, tpu.core_type = #tpu.core_type<tc>, window_params = [{transform_indices = @transform_0, window_bounds = array<i64: 1, 4, 130>}, {pipeline_mode = #tpu.pipeline_mode<synchronous>, transform_indices = @transform_1, window_bounds = array<i64: 16, 12>}, {pipeline_mode = #tpu.pipeline_mode<synchronous>, transform_indices = @transform_2, window_bounds = array<i64: 16, 1>}, {pipeline_mode = #tpu.pipeline_mode<synchronous>, transform_indices = @transform_3, window_bounds = array<i64: 16, 1>}, {transform_indices = @transform_4, window_bounds = array<i64: 1, 16, 128>}]} {
    %c0 = arith.constant 0 : index
    %c0_0 = arith.constant 0 : index
    %0 = vector.load %arg2[%c0, %c0_0] : memref<16x12xf32, #tpu.memory_space<vmem>>, vector<16x12xf32>
    %1 = arith.mulf %0, %0 : vector<16x12xf32>
    %cst = arith.constant dense<0.000000e+00> : vector<16xf32>
    %2 = vector.multi_reduction <add>, %1, %cst [1] : vector<16x12xf32> to vector<16xf32>
    %3 = vector.shape_cast %2 : vector<16xf32> to vector<16x1xf32>
    %c0_1 = arith.constant 0 : index
    %c0_2 = arith.constant 0 : index
    %4 = vector.load %arg3[%c0_1, %c0_2] : memref<16x1xf32, #tpu.memory_space<vmem>>, vector<16x1xf32>
    %5 = math.rsqrt %3 : vector<16x1xf32>
    %6 = arith.mulf %4, %5 : vector<16x1xf32>
    %7 = vector.broadcast %6 : vector<16x1xf32> to vector<16x12xf32>
    %8 = arith.mulf %0, %7 : vector<16x12xf32>
    %c0_3 = arith.constant 0 : index
    %c0_4 = arith.constant 0 : index
    %c0_5 = arith.constant 0 : index
    %9 = vector.load %arg1[%c0_3, %c0_4, %c0_5] : memref<1x4x130xf32, #tpu.memory_space<vmem>>, vector<1x4x130xf32>
    %10 = vector.shape_cast %9 : vector<1x4x130xf32> to vector<4x130xf32>
    %c0_6 = arith.constant 0 : index
    %c0_7 = arith.constant 0 : index
    %11 = vector.load %arg4[%c0_6, %c0_7] : memref<16x1xf32, #tpu.memory_space<vmem>>, vector<16x1xf32>
    %12 = vector.shape_cast %11 : vector<16x1xf32> to vector<16x1xf32>
    %13 = vector.broadcast %12 : vector<16x1xf32> to vector<16x128xf32>
    %14 = vector.extract_strided_slice %10 {offsets = [0, 0], sizes = [4, 128], strides = [1, 1]} : vector<4x130xf32> to vector<4x128xf32>
    %15 = vector.extract_strided_slice %8 {offsets = [0, 0], sizes = [16, 1], strides = [1, 1]} : vector<16x12xf32> to vector<16x1xf32>
    %16 = vector.extract_strided_slice %14 {offsets = [0, 0], sizes = [1, 128], strides = [1, 1]} : vector<4x128xf32> to vector<1x128xf32>
    %17 = vector.broadcast %15 : vector<16x1xf32> to vector<16x128xf32>
    %18 = vector.broadcast %16 : vector<1x128xf32> to vector<16x128xf32>
    %19 = arith.mulf %17, %18 : vector<16x128xf32>
    %20 = arith.addf %13, %19 : vector<16x128xf32>
    %21 = vector.extract_strided_slice %8 {offsets = [0, 3], sizes = [16, 1], strides = [1, 1]} : vector<16x12xf32> to vector<16x1xf32>
    %22 = vector.extract_strided_slice %14 {offsets = [1, 0], sizes = [1, 128], strides = [1, 1]} : vector<4x128xf32> to vector<1x128xf32>
    %23 = vector.broadcast %21 : vector<16x1xf32> to vector<16x128xf32>
    %24 = vector.broadcast %22 : vector<1x128xf32> to vector<16x128xf32>
    %25 = arith.mulf %23, %24 : vector<16x128xf32>
    %26 = arith.addf %20, %25 : vector<16x128xf32>
    %27 = vector.extract_strided_slice %8 {offsets = [0, 6], sizes = [16, 1], strides = [1, 1]} : vector<16x12xf32> to vector<16x1xf32>
    %28 = vector.extract_strided_slice %14 {offsets = [2, 0], sizes = [1, 128], strides = [1, 1]} : vector<4x128xf32> to vector<1x128xf32>
    %29 = vector.broadcast %27 : vector<16x1xf32> to vector<16x128xf32>
    %30 = vector.broadcast %28 : vector<1x128xf32> to vector<16x128xf32>
    %31 = arith.mulf %29, %30 : vector<16x128xf32>
    %32 = arith.addf %26, %31 : vector<16x128xf32>
    %33 = vector.extract_strided_slice %8 {offsets = [0, 9], sizes = [16, 1], strides = [1, 1]} : vector<16x12xf32> to vector<16x1xf32>
    %34 = vector.extract_strided_slice %14 {offsets = [3, 0], sizes = [1, 128], strides = [1, 1]} : vector<4x128xf32> to vector<1x128xf32>
    %35 = vector.broadcast %33 : vector<16x1xf32> to vector<16x128xf32>
    %36 = vector.broadcast %34 : vector<1x128xf32> to vector<16x128xf32>
    %37 = arith.mulf %35, %36 : vector<16x128xf32>
    %38 = arith.addf %32, %37 : vector<16x128xf32>
    %39 = vector.extract_strided_slice %10 {offsets = [0, 1], sizes = [4, 128], strides = [1, 1]} : vector<4x130xf32> to vector<4x128xf32>
    %40 = vector.extract_strided_slice %8 {offsets = [0, 1], sizes = [16, 1], strides = [1, 1]} : vector<16x12xf32> to vector<16x1xf32>
    %41 = vector.extract_strided_slice %39 {offsets = [0, 0], sizes = [1, 128], strides = [1, 1]} : vector<4x128xf32> to vector<1x128xf32>
    %42 = vector.broadcast %40 : vector<16x1xf32> to vector<16x128xf32>
    %43 = vector.broadcast %41 : vector<1x128xf32> to vector<16x128xf32>
    %44 = arith.mulf %42, %43 : vector<16x128xf32>
    %45 = arith.addf %38, %44 : vector<16x128xf32>
    %46 = vector.extract_strided_slice %8 {offsets = [0, 4], sizes = [16, 1], strides = [1, 1]} : vector<16x12xf32> to vector<16x1xf32>
    %47 = vector.extract_strided_slice %39 {offsets = [1, 0], sizes = [1, 128], strides = [1, 1]} : vector<4x128xf32> to vector<1x128xf32>
    %48 = vector.broadcast %46 : vector<16x1xf32> to vector<16x128xf32>
    %49 = vector.broadcast %47 : vector<1x128xf32> to vector<16x128xf32>
    %50 = arith.mulf %48, %49 : vector<16x128xf32>
    %51 = arith.addf %45, %50 : vector<16x128xf32>
    %52 = vector.extract_strided_slice %8 {offsets = [0, 7], sizes = [16, 1], strides = [1, 1]} : vector<16x12xf32> to vector<16x1xf32>
    %53 = vector.extract_strided_slice %39 {offsets = [2, 0], sizes = [1, 128], strides = [1, 1]} : vector<4x128xf32> to vector<1x128xf32>
    %54 = vector.broadcast %52 : vector<16x1xf32> to vector<16x128xf32>
    %55 = vector.broadcast %53 : vector<1x128xf32> to vector<16x128xf32>
    %56 = arith.mulf %54, %55 : vector<16x128xf32>
    %57 = arith.addf %51, %56 : vector<16x128xf32>
    %58 = vector.extract_strided_slice %8 {offsets = [0, 10], sizes = [16, 1], strides = [1, 1]} : vector<16x12xf32> to vector<16x1xf32>
    %59 = vector.extract_strided_slice %39 {offsets = [3, 0], sizes = [1, 128], strides = [1, 1]} : vector<4x128xf32> to vector<1x128xf32>
    %60 = vector.broadcast %58 : vector<16x1xf32> to vector<16x128xf32>
    %61 = vector.broadcast %59 : vector<1x128xf32> to vector<16x128xf32>
    %62 = arith.mulf %60, %61 : vector<16x128xf32>
    %63 = arith.addf %57, %62 : vector<16x128xf32>
    %64 = vector.extract_strided_slice %10 {offsets = [0, 2], sizes = [4, 128], strides = [1, 1]} : vector<4x130xf32> to vector<4x128xf32>
    %65 = vector.extract_strided_slice %8 {offsets = [0, 2], sizes = [16, 1], strides = [1, 1]} : vector<16x12xf32> to vector<16x1xf32>
    %66 = vector.extract_strided_slice %64 {offsets = [0, 0], sizes = [1, 128], strides = [1, 1]} : vector<4x128xf32> to vector<1x128xf32>
    %67 = vector.broadcast %65 : vector<16x1xf32> to vector<16x128xf32>
    %68 = vector.broadcast %66 : vector<1x128xf32> to vector<16x128xf32>
    %69 = arith.mulf %67, %68 : vector<16x128xf32>
    %70 = arith.addf %63, %69 : vector<16x128xf32>
    %71 = vector.extract_strided_slice %8 {offsets = [0, 5], sizes = [16, 1], strides = [1, 1]} : vector<16x12xf32> to vector<16x1xf32>
    %72 = vector.extract_strided_slice %64 {offsets = [1, 0], sizes = [1, 128], strides = [1, 1]} : vector<4x128xf32> to vector<1x128xf32>
    %73 = vector.broadcast %71 : vector<16x1xf32> to vector<16x128xf32>
    %74 = vector.broadcast %72 : vector<1x128xf32> to vector<16x128xf32>
    %75 = arith.mulf %73, %74 : vector<16x128xf32>
    %76 = arith.addf %70, %75 : vector<16x128xf32>
    %77 = vector.extract_strided_slice %8 {offsets = [0, 8], sizes = [16, 1], strides = [1, 1]} : vector<16x12xf32> to vector<16x1xf32>
    %78 = vector.extract_strided_slice %64 {offsets = [2, 0], sizes = [1, 128], strides = [1, 1]} : vector<4x128xf32> to vector<1x128xf32>
    %79 = vector.broadcast %77 : vector<16x1xf32> to vector<16x128xf32>
    %80 = vector.broadcast %78 : vector<1x128xf32> to vector<16x128xf32>
    %81 = arith.mulf %79, %80 : vector<16x128xf32>
    %82 = arith.addf %76, %81 : vector<16x128xf32>
    %83 = vector.extract_strided_slice %8 {offsets = [0, 11], sizes = [16, 1], strides = [1, 1]} : vector<16x12xf32> to vector<16x1xf32>
    %84 = vector.extract_strided_slice %64 {offsets = [3, 0], sizes = [1, 128], strides = [1, 1]} : vector<4x128xf32> to vector<1x128xf32>
    %85 = vector.broadcast %83 : vector<16x1xf32> to vector<16x128xf32>
    %86 = vector.broadcast %84 : vector<1x128xf32> to vector<16x128xf32>
    %87 = arith.mulf %85, %86 : vector<16x128xf32>
    %88 = arith.addf %82, %87 : vector<16x128xf32>
    %c0_8 = arith.constant 0 : index
    %c0_9 = arith.constant 0 : index
    %c0_10 = arith.constant 0 : index
    %89 = vector.load %arg5[%c0_8, %c0_9, %c0_10] : memref<1x16x128xf32, #tpu.memory_space<vmem>>, vector<1x16x128xf32>
    %90 = vector.shape_cast %89 : vector<1x16x128xf32> to vector<16x128xf32>
    %91 = vector.shape_cast %88 : vector<16x128xf32> to vector<1x16x128xf32>
    tpu.vector_store %arg5[%c0_8, %c0_9, %c0_10], %91 {strides = array<i32>} : memref<1x16x128xf32, #tpu.memory_space<vmem>>, vector<1x16x128xf32>,
    return
  }
  func.func @transform_0(%arg0: i32) -> (i32, i32, i32) {
    %c0_i32 = arith.constant 0 : i32
    %c0_i32_0 = arith.constant 0 : i32
    %c0_i32_1 = arith.constant 0 : i32
    return %arg0, %c0_i32, %c0_i32_0 : i32, i32, i32
  }
  func.func @transform_1(%arg0: i32) -> (i32, i32) {
    %c0_i32 = arith.constant 0 : i32
    %c0_i32_0 = arith.constant 0 : i32
    %c0_i32_1 = arith.constant 0 : i32
    return %c0_i32, %c0_i32_0 : i32, i32
  }
  func.func @transform_2(%arg0: i32) -> (i32, i32) {
    %c0_i32 = arith.constant 0 : i32
    %c0_i32_0 = arith.constant 0 : i32
    %c0_i32_1 = arith.constant 0 : i32
    return %c0_i32, %c0_i32_0 : i32, i32
  }
  func.func @transform_3(%arg0: i32) -> (i32, i32) {
    %c0_i32 = arith.constant 0 : i32
    %c0_i32_0 = arith.constant 0 : i32
    %c0_i32_1 = arith.constant 0 : i32
    return %c0_i32, %c0_i32_0 : i32, i32
  }
  func.func @transform_4(%arg0: i32) -> (i32, i32, i32) {
    %c0_i32 = arith.constant 0 : i32
    %c0_i32_0 = arith.constant 0 : i32
    %c0_i32_1 = arith.constant 0 : i32
    return %arg0, %c0_i32, %c0_i32_0 : i32, i32, i32
  }
}

</mosaic_0001>

<bundles_post_ra>
// kernel: weight_norm_conv1d.1
= control target key start
LH: loop header
LB: loop body
LE: loop exit
PB: predicated region body
PF: predicated region fallthrough
CT: control target
= control target key end

     0   :  { %9 = vsyncpa [#allocation3], 0  ;;  %s1043_s0 = inlined_call_operand.vmem [shape: f32[2,4,130], index: 0, kind: input, shape index: {}]   ;;  %s1044_s1 = inlined_call_operand.vmem [shape: f32[16,12], index: 1, kind: input, shape index: {}]   ;;  %s1045_s2 = inlined_call_operand.vmem [shape: f32[16,1], index: 2, kind: input, shape index: {}]   ;;  %s1046_s3 = inlined_call_operand.vmem [shape: f32[16,1], index: 3, kind: input, shape index: {}]   ;;  %s1047_s4 = inlined_call_operand.hbm [shape: f32[2,16,128], index: 4, kind: output, shape index: {}]  }
   0x1   :  { %11 = vsyncpa [#allocation3 + $0x1], 0  ;;  %s860_s15 = smov 0   ;;  %s862_s16 = smov 0  }
   0x2   :  { %s864_s17 = smov 0   ;;  %s866_s18 = smov 0  }
   0x3 LB: > { %s881_s19 = sadd.s32 4294967295, %s817_s18   ;;  %s657_s20 = sadd.s32 4294967294, %s817_s18   ;;  %s817_s18 = sphi %s866_s18, %s1053_s18   ;;  %s813_s17 = sphi %s864_s17, %s1052_s17   ;;  %s809_s16 = sphi %s862_s16, %s1051_s16   ;;  %s805_s15 = sphi %s860_s15, %s1050_s15  }
   0x4   : > { %s885_s21 = sadd.s32 1, %s817_s18   ;;  %s113_s22 = sadd.s32 1, %s813_s17 }
   0x5   : > { %s110_s23 = ssub.s32 %s817_s18, %s885_s21  ;;  %p123_p0 = scmp.ne.s32.totalorder %s813_s17, %s809_s16 }
   0x6   : > { %p111_p1 = scmp.eq.s32.totalorder %s110_s23, 0  ;;  %p124_p2 = scmp.eq.s32.totalorder %s881_s19, 1 }
   0x7   : > { %p129_p3 = scmp.ne.s32.totalorder %s809_s16, %s805_s15  ;;  %p130_p4 = scmp.eq.s32.totalorder %s657_s20, 1 }
   0x8   : > { %s896_s24 = scalar_select %p111_p1, %s813_s17, %s113_s22  }
   0x9   : > { %p898_p5 = por %p124_p2, %p123_p0  ;;  %p902_p6 = por %p130_p4, %p129_p3 }
   0xa   : > { %p660_p7 = scmp.ge.s32.totalorder %s817_s18, 1  ;;  %p165_p8 = scmp.lt.s32.totalorder %s817_s18, 3 }
   0xc   : > { %p166_p9 = pnand %p660_p7, %p165_p8 }
   0xd   : > { %p191_p10 = scmp.lt.s32.totalorder (!%p166_p9), %s881_s19, 1  ;;  %s831_s27 = smov (!%p166_p9), 127  }
   0xe   : > { %169 = sbr.rel (%p166_p9) target bundleno = 637 (0x27d), region = 36  ;;  %s832_s28 = smov (!%p166_p9), 126  }
   0xf   : > { %s188_s29 = sand.u32 (!%p166_p9), 1, %s809_s16   ;;  %s670_s5 = sshll.u32 (!%p166_p9), %s881_s19, 4 }
  0x10   : > { %s661_s30 = sshll.u32 (!%p166_p9), %s188_s29, 4  ;;  %s591_s8 = scalar_lea.hbm (!%p166_p9), %s1047_s4, %s670_s5 }
  0x11   : > { %s190_s9 = scalar_lea.vmem (!%p166_p9), [#allocation2], %s661_s30  ;;  %s580_s11 = scalar_lea.sflag (!%p166_p9), [#allocation3], %s188_s29 }
  0x12   : > { %s592_s10 = sshll.u32 (!%p166_p9), %s190_s9, 4  ;;  %s775_s22 = scalar_lea.hbm (!%p166_p9), %s1047_s4, 32  ;;  %s593_s10 = int_to_ptr.vmem [resolvable:$true] %s592_s10 }
  0x13   : > { %v196_v0 = vld [vmem:[%s1044_s1] sm:$0xff]  ;;  %vm200_vm0 = vcmask 97280   ;;  %v197_v2 = vld [vmem:[%s1044_s1 + $0x8] sm:$0xff]  ;;  %v819_v6 = vmov 0   ;;  %v820_v29 = vmov 3   ;;  %v821_v34 = vmov 6  }
  0x14   : > { %v198_v1 = vmul.f32 %v196_v0, %v196_v0  ;;  %v199_v4 = vmul.f32 %v197_v2, %v197_v2  ;;  %727 = vset.pattern.permute.xlu1 %v819_v6  ;;  %726 = vset.pattern.permute.xlu2 %v819_v6  ;;  %v244_v7 = vld [vmem:[%s1046_s3] sm:$0xff]  ;;  %v245_v9 = vld [vmem:[%s1046_s3 + $0x8] sm:$0xff]  ;;  %v822_v35 = vmov 4   ;;  %v823_v36 = vmov 9   ;;  %s192_s13 = scalar_select %p191_p10, %s881_s19, 1 }
  0x15   : > { %728 = vset.pattern.permute.xlu0 %v819_v6  ;;  %248 = vperm.xlu2 %726, %v244_v7   ;;  %v207_v18 = vld [vmem:[%s1045_s2] sm:$0xff]  ;;  %v208_v26 = vld [vmem:[%s1045_s2 + $0x8] sm:$0xff]  ;;  %v824_v37 = vmov 5   ;;  %v825_v38 = vmov 1   ;;  %v826_v39 = vmov 11   ;;  %v827_v40 = vmov 7  }
  0x16   : > { %v201_v3 = vsel %vm200_vm0, %v198_v1, 0.0  ;;  %v204_v5 = vsel %vm200_vm0, %v199_v4, 0.0  ;;  %v828_v41 = vmov 10   ;;  %v829_v42 = vmov 2   ;;  %s669_s14 = sshll.u32 %s192_s13, 3  ;;  %s594_s19 = sshll.u32 %s591_s8, 4  ;;  %s595_s19 = int_to_ptr.hbm [resolvable:$true] %s594_s19 }
  0x17   : > { %202 = vadd.xlane.f32.xlu0 %v201_v3  ;;  %v830_v43 = vmov 8   ;;  %s195_s23 = scalar_lea.vmem %s1043_s0, %s669_s14  ;;  %vm341_vm7 = vcmask 1039360   ;;  %vm480_vm8 = vcmask 1031168   ;;  %s769_s12 = sshra.s32 %s595_s19, 4  ;;  %s770_s12 = int_to_ptr.hbm [resolvable:$true] %s769_s12 }
  0x18   : > { %v931_v49 = vld [vmem:[%s195_s23] sm:$0xff]  ;;  %s771_s13 = scalar_lea.hbm %s770_s12, 16  ;;  %p776_p0 = scmp.lt.s32.totalorder %s770_s12, %s1047_s4 }
  0x19   : > { %v266_v50 = vperm.slane %v931_v49, 0  ;;  %v320_v51 = vperm.slane %v931_v49, 4  ;;  %v279_v52 = vperm.slane %v931_v49, 1  ;;  %v292_v54 = vperm.slane %v931_v49, 2  ;;  %p772_p11 = scmp.ne.s32.totalorder %s770_s12, %s771_s13  ;;  %p777_p1 = scmp.lt.s32.totalorder %s775_s22, %s771_s13 }
  0x1a   : > { %v305_v59 = vperm.slane %v931_v49, 3 }
  0x1b   : > { %v937_v56 = vperm.slane %v266_v50, 0  ;;  %v939_v57 = vperm.slane %v320_v51, 0  ;;  %p773_p12 = pnand %p772_p11, %p898_p5  ;;  %p778_p2 = por %p777_p1, %p776_p0 }
  0x1d   : > { %253 = vperm.xlu2 %726, %v245_v9   ;;  %p774_p13 = pneg %p773_p12 }
  0x1f   : > { %205 = vadd.xlane.f32.xlu0 %v204_v5  ;;  %p779_p3 = pnand %p778_p2, %p774_p13 }
  0x25   : > { %729 = vset.pattern.permute.xlu2 %v820_v29 }
  0x6f   : > { %v249_v44 = vpop.permute.xlu2 %248 }
  0x77   : > { %v254_v45 = vpop.permute.xlu2 %253 }
  0x8a   : > { %v203_v8 = vpop.xlane.xlu0 %202 }
  0x8b   : > { %751 = vrsqrt.f32 %v203_v8  ;;  %vm215_vm2 = vweird.f32 %v203_v8 }
  0x91   : > { %v752_v10 = vpop.eup %751 }
  0x92   : > { %v210_v11 = vmul.f32 %v752_v10, %v203_v8  ;;  %v206_v12 = vpop.xlane.xlu0 %205  ;;  %vm216_vm1 = vweird.f32 %v752_v10 }
  0x93   : > { %753 = vrsqrt.f32 %v206_v12  ;;  %vm217_vm3 = vmor %vm215_vm2, %vm216_vm1  ;;  %vm225_vm5 = vweird.f32 %v206_v12 }
  0x94   : > { %v211_v13 = vmul.f32 %v752_v10, %v210_v11 }
  0x96   : > { %v212_v14 = vmul.f32 0.5, %v211_v13 }
  0x98   : > { %v213_v15 = vsub.f32 1.5, %v212_v14 }
  0x99   : > { %v754_v16 = vpop.eup %753 }
  0x9a   : > { %v220_v17 = vmul.f32 %v754_v16, %v206_v12  ;;  %v214_v19 = vmul.f32 %v752_v10, %v213_v15  ;;  %vm226_vm4 = vweird.f32 %v754_v16 }
  0x9b   : > { %vm227_vm6 = vmor %vm225_vm5, %vm226_vm4 }
  0x9c   : > { %v221_v20 = vmul.f32 %v754_v16, %v220_v17  ;;  %v218_v21 = vsel %vm217_vm3, %v752_v10, %v214_v19 }
  0x9d   : > { %v229_v22 = vmul.f32 %v218_v21, %v207_v18  ;;  %v357_v18 = vperm.slane %v931_v49, 5  ;;  %v360_v21 = vperm.slane %v279_v52, 1 }
  0x9e   : > { %v222_v23 = vmul.f32 0.5, %v221_v20 }
  0x9f   : > { %233 = vperm.xlu1 %727, %v229_v22   ;;  %v361_v22 = vperm.slane %v357_v18, 1 }
  0xa0   : > { %v223_v24 = vsub.f32 1.5, %v222_v23 }
  0xa2   : > { %v224_v25 = vmul.f32 %v754_v16, %v223_v24 }
  0xa4   : > { %v228_v27 = vsel %vm227_vm6, %v754_v16, %v224_v25 }
  0xa5   : > { %v230_v28 = vmul.f32 %v228_v27, %v208_v26 }
  0xa7   : > { %238 = vperm.xlu1 %727, %v230_v28   ;;  %v393_v28 = vperm.slane %v931_v49, 6 }
 0x111   : > { %v234_v30 = vpop.permute.xlu1 %233 }
 0x112   : > { %v241_v31 = vmul.f32 %v234_v30, %v196_v0  ;;  %v397_v30 = vperm.slane %v393_v28, 2 }
 0x114   : > { %272 = vperm.xlu2 %729, %v241_v31   ;;  %258 = vperm.xlu0 %728, %v241_v31  }
 0x119   : > { %v239_v32 = vpop.permute.xlu1 %238 }
 0x11a   : > { %v242_v33 = vmul.f32 %v239_v32, %v197_v2 }
 0x11c   : > { %731 = vset.pattern.permute.xlu2 %v821_v34  ;;  %737 = vset.pattern.permute.xlu0 %v822_v35 }
 0x11d   : > { %263 = vperm.xlu1 %727, %v242_v33   ;;  %285 = vperm.xlu2 %731, %v241_v31  }
 0x11e   : > { %349 = vperm.xlu0 %737, %v241_v31  }
 0x125   : > { %730 = vset.pattern.permute.xlu1 %v820_v29  ;;  %733 = vset.pattern.permute.xlu2 %v823_v36  ;;  %v396_v29 = vperm.slane %v292_v54, 2 }
 0x126   : > { %745 = vset.pattern.permute.xlu0 %v824_v37  ;;  %276 = vperm.xlu1 %730, %v242_v33  }
 0x127   : > { %298 = vperm.xlu2 %733, %v241_v31   ;;  %488 = vperm.xlu0 %745, %v241_v31  }
 0x12e   : > { %732 = vset.pattern.permute.xlu1 %v821_v34 }
 0x12f   : > { %735 = vset.pattern.permute.xlu2 %v825_v38  ;;  %750 = vset.pattern.permute.xlu0 %v826_v39 }
 0x130   : > { %289 = vperm.xlu1 %732, %v242_v33   ;;  %311 = vperm.xlu2 %735, %v241_v31  }
 0x131   : > { %552 = vperm.xlu0 %750, %v242_v33  }
 0x138   : > { %734 = vset.pattern.permute.xlu1 %v823_v36  ;;  %740 = vset.pattern.permute.xlu2 %v827_v40  ;;  %v429_v36 = vperm.slane %v931_v49, 7 }
 0x139   : > { %302 = vperm.xlu1 %734, %v242_v33   ;;  %389 = vperm.xlu2 %740, %v242_v33  }
 0x141   : > { %736 = vset.pattern.permute.xlu1 %v825_v38  ;;  %742 = vset.pattern.permute.xlu2 %v828_v41  ;;  %v433_v38 = vperm.slane %v429_v36, 3 }
 0x142   : > { %315 = vperm.xlu1 %736, %v242_v33   ;;  %425 = vperm.xlu2 %742, %v242_v33  }
 0x14a   : > { %738 = vset.pattern.permute.xlu1 %v822_v35  ;;  %744 = vset.pattern.permute.xlu2 %v829_v42 }
 0x14b   : > { %353 = vperm.xlu1 %738, %v242_v33   ;;  %461 = vperm.xlu2 %744, %v242_v33  }
 0x153   : > { %739 = vset.pattern.permute.xlu1 %v827_v40  ;;  %747 = vset.pattern.permute.xlu2 %v830_v43 }
 0x154   : > { %385 = vperm.xlu1 %739, %v241_v31   ;;  %518 = vperm.xlu2 %747, %v241_v31  }
 0x15c   : > { %741 = vset.pattern.permute.xlu1 %v828_v41  ;;  %749 = vset.pattern.permute.xlu2 %v826_v39 }
 0x15d   : > { %421 = vperm.xlu1 %741, %v241_v31   ;;  %548 = vperm.xlu2 %749, %v241_v31  }
 0x165   : > { %743 = vset.pattern.permute.xlu1 %v829_v42  ;;  %v432_v42 = vperm.slane %v305_v59, 3 }
 0x166   : > { %457 = vperm.xlu1 %743, %v241_v31  }
 0x16e   : > { %746 = vset.pattern.permute.xlu1 %v824_v37  ;;  %v273_v46 = vpop.permute.xlu2 %272 }
 0x16f   : > { %492 = vperm.xlu1 %746, %v242_v33   ;;  %v280_v58 = vmul.f32 %v279_v52, %v273_v46 }
 0x177   : > { %748 = vset.pattern.permute.xlu1 %v830_v43  ;;  %v286_v47 = vpop.permute.xlu2 %285 }
 0x178   : > { %522 = vperm.xlu1 %748, %v242_v33   ;;  %v293_v62 = vmul.f32 %v292_v54, %v286_v47 }
 0x181   : > { %v299_v48 = vpop.permute.xlu2 %298 }
 0x182   : > { %v306_v2 = vmul.f32 %v305_v59, %v299_v48 }
 0x186   : > { %v259_v53 = vpop.permute.xlu0 %258 }
 0x187   : > { %v267_v55 = vmul.f32 %v266_v50, %v259_v53 }
 0x189   : > { %v269_v60 = vadd.f32 %v267_v55, %v249_v44 }
 0x18a   : > { %v312_v61 = vpop.permute.xlu2 %311 }
 0x18b   : > { %v282_v63 = vadd.f32 %v280_v58, %v269_v60  ;;  %v325_v0 = vmul.f32 %v937_v56, %v312_v61  ;;  %v326_v1 = vmul.f32 %v939_v57, %v312_v61 }
 0x18d   : > { %v295_v3 = vadd.f32 %v293_v62, %v282_v63  ;;  %335 = vrot.lane.b32.xlu0 %v326_v1, %s831_s27  ;;  %333 = vrot.lane.b32.xlu2 %v325_v0, %s831_s27 }
 0x18f   : > { %v264_v4 = vpop.permute.xlu1 %263  ;;  %v946_v5 = vadd.f32 %v306_v2, %v295_v3 }
 0x190   : > { %v268_v6 = vmul.f32 %v266_v50, %v264_v4  ;;  %v350_v23 = vpop.permute.xlu0 %349 }
 0x191   : > { %v362_v24 = vmul.f32 %v360_v21, %v350_v23  ;;  %v363_v25 = vmul.f32 %v361_v22, %v350_v23 }
 0x192   : > { %v270_v7 = vadd.f32 %v268_v6, %v254_v45 }
 0x193   : > { %v390_v35 = vpop.permute.xlu2 %389 }
 0x194   : > { %v400_v37 = vmul.f32 %v396_v29, %v390_v35  ;;  %v401_v39 = vmul.f32 %v397_v30, %v390_v35 }
 0x198   : > { %v277_v8 = vpop.permute.xlu1 %276 }
 0x199   : > { %v281_v9 = vmul.f32 %v279_v52, %v277_v8  ;;  %v489_v52 = vpop.permute.xlu0 %488 }
 0x19a   : > { %v496_v55 = vmul.f32 %v489_v52, %v361_v22 }
 0x19b   : > { %v283_v10 = vadd.f32 %v281_v9, %v270_v7 }
 0x19c   : > { %v426_v43 = vpop.permute.xlu2 %425 }
 0x19d   : > { %v436_v44 = vmul.f32 %v432_v42, %v426_v43  ;;  %v437_v50 = vmul.f32 %v433_v38, %v426_v43 }
 0x1a2   : > { %v290_v11 = vpop.permute.xlu1 %289 }
 0x1a3   : > { %v294_v12 = vmul.f32 %v292_v54, %v290_v11  ;;  %v495_v54 = vmul.f32 %v489_v52, %v360_v21  ;;  %v553_v63 = vpop.permute.xlu0 %552 }
 0x1a4   : > { %v557_v9 = vmul.f32 %v553_v63, %v432_v42  ;;  %v558_v11 = vmul.f32 %v553_v63, %v433_v38 }
 0x1a5   : > { %v296_v13 = vadd.f32 %v294_v12, %v283_v10  ;;  %v462_v49 = vpop.permute.xlu2 %461 }
 0x1a6   : > { %v466_v51 = vmul.f32 %v462_v49, %v937_v56  ;;  %v467_v53 = vmul.f32 %v462_v49, %v939_v57 }
 0x1ab   : > { %v303_v14 = vpop.permute.xlu1 %302 }
 0x1ac   : > { %v307_v15 = vmul.f32 %v305_v59, %v303_v14 }
 0x1ae   : > { %v948_v16 = vadd.f32 %v307_v15, %v296_v13  ;;  %v519_v59 = vpop.permute.xlu2 %518 }
 0x1af   : > { %v526_v62 = vmul.f32 %v519_v59, %v397_v30 }
 0x1b4   : > { %v316_v17 = vpop.permute.xlu1 %315 }
 0x1b5   : > { %v327_v19 = vmul.f32 %v937_v56, %v316_v17  ;;  %v328_v20 = vmul.f32 %v939_v57, %v316_v17 }
 0x1b7   : > { %337 = vrot.lane.b32.xlu1 %v327_v19, %s831_s27  ;;  %339 = vrot.lane.b32.xlu2 %v328_v20, %s831_s27  ;;  %v549_v0 = vpop.permute.xlu2 %548 }
 0x1b8   : > { %v555_v3 = vmul.f32 %v549_v0, %v432_v42  ;;  %v556_v4 = vmul.f32 %v549_v0, %v433_v38 }
 0x1bd   : > { %v354_v26 = vpop.permute.xlu1 %353 }
 0x1be   : > { %v365_v27 = vmul.f32 %v361_v22, %v354_v26  ;;  %v364_v31 = vmul.f32 %v360_v21, %v354_v26 }
 0x1bf   : > { %372 = vrot.lane.b32.xlu1 %v363_v25, %s831_s27  ;;  %370 = vrot.lane.b32.xlu2 %v362_v24, %s831_s27 }
 0x1c0   : > { %376 = vrot.lane.b32.xlu0 %v365_v27, %s831_s27 }
 0x1c6   : > { %v386_v32 = vpop.permute.xlu1 %385 }
 0x1c7   : > { %v398_v33 = vmul.f32 %v396_v29, %v386_v32  ;;  %v399_v34 = vmul.f32 %v397_v30, %v386_v32  ;;  %374 = vrot.lane.b32.xlu2 %v364_v31, %s831_s27 }
 0x1c9   : > { %406 = vrot.lane.b32.xlu0 %v398_v33, %s831_s27  ;;  %408 = vrot.lane.b32.xlu1 %v399_v34, %s831_s27 }
 0x1cf   : > { %v422_v40 = vpop.permute.xlu1 %421  ;;  %410 = vrot.lane.b32.xlu2 %v400_v37, %s831_s27 }
 0x1d0   : > { %v435_v41 = vmul.f32 %v433_v38, %v422_v40  ;;  %v434_v45 = vmul.f32 %v432_v42, %v422_v40 }
 0x1d1   : > { %412 = vrot.lane.b32.xlu0 %v401_v39, %s831_s27 }
 0x1d2   : > { %444 = vrot.lane.b32.xlu1 %v435_v41, %s831_s27 }
 0x1d7   : > { %446 = vrot.lane.b32.xlu2 %v436_v44, %s831_s27 }
 0x1d8   : > { %v458_v46 = vpop.permute.xlu1 %457 }
 0x1d9   : > { %v464_v47 = vmul.f32 %v458_v46, %v937_v56  ;;  %442 = vrot.lane.b32.xlu0 %v434_v45, %s831_s27  ;;  %v465_v48 = vmul.f32 %v458_v46, %v939_v57  ;;  %v525_v56 = vmul.f32 %v519_v59, %v396_v29 }
 0x1db   : > { %472 = vrot.lane.b32.xlu1 %v464_v47, %s832_s28 }
 0x1df   : > { %474 = vrot.lane.b32.xlu2 %v465_v48, %s832_s28 }
 0x1e1   : > { %448 = vrot.lane.b32.xlu0 %v437_v50, %s831_s27  ;;  %v493_v58 = vpop.permute.xlu1 %492 }
 0x1e2   : > { %v497_v60 = vmul.f32 %v493_v58, %v360_v21  ;;  %v498_v61 = vmul.f32 %v493_v58, %v361_v22 }
 0x1e3   : > { %476 = vrot.lane.b32.xlu1 %v466_v51, %s832_s28 }
 0x1e7   : > { %478 = vrot.lane.b32.xlu2 %v467_v53, %s832_s28  ;;  %v334_v6 = vpop.permute.xlu2 %333 }
 0x1e9   : > { %503 = vrot.lane.b32.xlu0 %v495_v54, %s832_s28 }
 0x1ea   : > { %v523_v57 = vpop.permute.xlu1 %522 }
 0x1eb   : > { %505 = vrot.lane.b32.xlu1 %v496_v55, %s832_s28  ;;  %v527_v1 = vmul.f32 %v523_v57, %v396_v29  ;;  %v528_v2 = vmul.f32 %v523_v57, %v397_v30 }
 0x1ef   : > { %507 = vrot.lane.b32.xlu2 %v497_v60, %s832_s28 }
 0x1f1   : > { %509 = vrot.lane.b32.xlu0 %v498_v61, %s832_s28 }
 0x1f3   : > { %533 = vrot.lane.b32.xlu1 %v525_v56, %s832_s28 }
 0x1f7   : > { %535 = vrot.lane.b32.xlu2 %v526_v62, %s832_s28 }
 0x1f9   : > { %537 = vrot.lane.b32.xlu0 %v527_v1, %s832_s28 }
 0x1fb   : > { %539 = vrot.lane.b32.xlu1 %v528_v2, %s832_s28 }
 0x1ff   : > { %563 = vrot.lane.b32.xlu2 %v555_v3, %s832_s28  ;;  %v336_v7 = vpop.permute.xlu0 %335 }
 0x200   : > { %v342_v8 = vsel %vm341_vm7, %v334_v6, %v336_v7 }
 0x201   : > { %v346_v10 = vadd.f32 %v342_v8, %v946_v5  ;;  %565 = vrot.lane.b32.xlu0 %v556_v4, %s832_s28 }
 0x203   : > { %567 = vrot.lane.b32.xlu1 %v557_v9, %s832_s28 }
 0x207   : > { %569 = vrot.lane.b32.xlu2 %v558_v11, %s832_s28 }
 0x211   : > { %v340_v12 = vpop.permute.xlu2 %339 }
 0x219   : > { %v371_v13 = vpop.permute.xlu2 %370 }
 0x221   : > { %v375_v14 = vpop.permute.xlu2 %374 }
 0x229   : > { %v338_v15 = vpop.permute.xlu1 %337  ;;  %v411_v19 = vpop.permute.xlu2 %410 }
 0x22a   : > { %v343_v17 = vsel %vm341_vm7, %v338_v15, %v340_v12 }
 0x22b   : > { %v347_v18 = vadd.f32 %v343_v17, %v948_v16 }
 0x231   : > { %v373_v21 = vpop.permute.xlu1 %372  ;;  %v447_v22 = vpop.permute.xlu2 %446 }
 0x232   : > { %v377_v20 = vpop.permute.xlu0 %376  ;;  %v378_v36 = vsel %vm341_vm7, %v371_v13, %v373_v21 }
 0x233   : > { %v379_v38 = vsel %vm341_vm7, %v375_v14, %v377_v20  ;;  %v382_v40 = vadd.f32 %v378_v36, %v346_v10 }
 0x234   : > { %v383_v43 = vadd.f32 %v379_v38, %v347_v18 }
 0x239   : > { %v475_v24 = vpop.permute.xlu2 %474 }
 0x23b   : > { %v407_v5 = vpop.permute.xlu0 %406  ;;  %v409_v23 = vpop.permute.xlu1 %408 }
 0x23c   : > { %v414_v39 = vsel %vm341_vm7, %v407_v5, %v409_v23 }
 0x23d   : > { %v418_v44 = vadd.f32 %v414_v39, %v382_v40 }
 0x241   : > { %v479_v28 = vpop.permute.xlu2 %478 }
 0x243   : > { %v413_v25 = vpop.permute.xlu0 %412 }
 0x244   : > { %v445_v26 = vpop.permute.xlu1 %444  ;;  %v415_v41 = vsel %vm341_vm7, %v411_v19, %v413_v25 }
 0x245   : > { %v419_v46 = vadd.f32 %v415_v41, %v383_v43 }
 0x249   : > { %v508_v32 = vpop.permute.xlu2 %507 }
 0x24b   : > { %v443_v27 = vpop.permute.xlu0 %442 }
 0x24c   : > { %v450_v42 = vsel %vm341_vm7, %v443_v27, %v445_v26 }
 0x24d   : > { %v473_v29 = vpop.permute.xlu1 %472  ;;  %v454_v47 = vadd.f32 %v450_v42, %v418_v44 }
 0x24e   : > { %v481_v50 = vsel %vm480_vm8, %v473_v29, %v475_v24 }
 0x24f   : > { %v485_v55 = vadd.f32 %v481_v50, %v454_v47 }
 0x251   : > { %v536_v35 = vpop.permute.xlu2 %535 }
 0x253   : > { %v449_v30 = vpop.permute.xlu0 %448 }
 0x254   : > { %v451_v45 = vsel %vm341_vm7, %v447_v22, %v449_v30 }
 0x255   : > { %v477_v31 = vpop.permute.xlu1 %476  ;;  %v455_v51 = vadd.f32 %v451_v45, %v419_v46 }
 0x256   : > { %v482_v53 = vsel %vm480_vm8, %v477_v31, %v479_v28 }
 0x257   : > { %v486_v60 = vadd.f32 %v482_v53, %v455_v51 }
 0x259   : > { %v564_v48 = vpop.permute.xlu2 %563 }
 0x25b   : > { %v504_v33 = vpop.permute.xlu0 %503 }
 0x25d   : > { %v506_v34 = vpop.permute.xlu1 %505 }
 0x25e   : > { %v511_v54 = vsel %vm480_vm8, %v504_v33, %v506_v34 }
 0x25f   : > { %v515_v61 = vadd.f32 %v511_v54, %v485_v55 }
 0x261   : > { %v570_v1 = vpop.permute.xlu2 %569 }
 0x263   : > { %v510_v16 = vpop.permute.xlu0 %509 }
 0x264   : > { %v512_v58 = vsel %vm480_vm8, %v508_v32, %v510_v16 }
 0x265   : > { %v534_v37 = vpop.permute.xlu1 %533  ;;  %v516_v57 = vadd.f32 %v512_v58, %v486_v60 }
 0x266   : > { %v541_v59 = vsel %vm480_vm8, %v534_v37, %v536_v35 }
 0x267   : > { %v545_v62 = vadd.f32 %v541_v59, %v515_v61 }
 0x26b   : > { %v538_v49 = vpop.permute.xlu0 %537 }
 0x26d   : > { %v540_v52 = vpop.permute.xlu1 %539 }
 0x26e   : > { %v542_v56 = vsel %vm480_vm8, %v538_v49, %v540_v52 }
 0x26f   : > { %v546_v2 = vadd.f32 %v542_v56, %v516_v57 }
 0x273   : > { %v566_v63 = vpop.permute.xlu0 %565 }
 0x274   : > { %v571_v0 = vsel %vm480_vm8, %v564_v48, %v566_v63 }
 0x275   : > { %v575_v3 = vadd.f32 %v571_v0, %v545_v62  ;;  %v568_v4 = vpop.permute.xlu1 %567 }
 0x276   : > { %v572_v6 = vsel %vm480_vm8, %v568_v4, %v570_v1 }
 0x277   : > { %577 = vst [vmem:[%s190_s9] sm:$0xff] %v575_v3  ;;  %v576_v7 = vadd.f32 %v572_v6, %v546_v2 }
 0x279   : > { %578 = vst [vmem:[%s190_s9 + $0x8] sm:$0xff] %v576_v7 }
 0x27a   : > { %782 = shalt.err (!%p779_p3)
}
 0x27b   : > { %s833_s28 = smov 128   ;;  %s834_s29 = smov 8  }
 0x27c   : > { %671 = dma.vmem_to_hbm [thread:$0]  (%p898_p5), %s593_s10, 256, %s595_s19, %s580_s11, %s833_s28, %s833_s28, %s834_s29  }
 0x27d PF: > { %p677_p4 = scmp.ge.s32.totalorder %s817_s18, 2  ;;  %s609_s30 = sand.u32 1, %s805_s15  }
 0x27e   : > { %s610_s5 = scalar_lea.sflag [#allocation3], %s609_s30 }
 0x27f   : > { %p674_p7 = pnand %p677_p4, %p902_p6 }
 0x281   : > { %p675_p8 = pneg %p674_p7 }
 0x283   : > { %800 = dma.done.wait (%p675_p8), %s610_s5, 256  }
 0x284   : > { %802 = vsyncadd (%p675_p8), %s610_s5, 4294967040  ;;  %p14_p9 = scmp.ge.s32.totalorder %s885_s21, 4   ;;  %s1050_s15 = smov %s809_s16 }
 0x285   : > { %s1051_s16 = smov %s813_s17  ;;  %s1052_s17 = smov %s896_s24 }
 0x286   : > { %s1053_s18 = smov %s885_s21  ;;  %16 = sbr.rel (!%p14_p9) target bundleno = 3 (0x3), region = 71 }
 0x28b   :  { %616 = vsyncpa [#allocation3], 1 }
 0x28c   :  { %618 = vsyncpa [#allocation3 + $0x1], 1 }

</bundles_post_ra>
